<compile_context>
chip_gen: v5e
topology: v5e:2x2
jax: 0.10.0
libtpu: 0.0.40
codegen_flags: <defaults>
</compile_context>

<pallas_src>
import functools
import math

import jax
import jax.numpy as jnp
from jax import lax
from jax.experimental import pallas as pl
from jax.experimental.pallas import tpu as pltpu


def _categorical_kernel(z_ref, w_ref, b_ref, out_ref, acc_ref, *,
                        categories_dim):
    """Grid = (out tile j, batch tile i, k tile).  Produces one (tm, tn) tile
    of softmax(z @ W^T + b), softmax taken over contiguous groups of
    `categories_dim` output columns (tn % categories_dim == 0)."""
    k = pl.program_id(2)
    nk = pl.num_programs(2)

    @pl.when(k == 0)
    def _init():
        acc_ref[...] = jnp.zeros_like(acc_ref)

    # MXU: contract z dim 1 with weight dim 1 (PyTorch (out, in) layout, no
    # transpose).  Operands arrive already in the compute dtype; f32 accum.
    acc_ref[...] += lax.dot_general(
        z_ref[...], w_ref[...], (((1,), (1,)), ((), ())),
        preferred_element_type=jnp.float32)

    @pl.when(k == nk - 1)
    def _finalize():
        h = acc_ref[...] + b_ref[...]                       # (tm, tn) f32
        tm, tn = h.shape
        groups = tn // categories_dim
        shape3 = (tm, groups, categories_dim)

        # Group-wise reductions on the small 3-D view; heavy elementwise work
        # (exp, divide) stays on the lane-dense flat (tm, tn) tile.
        m = jnp.max(h.reshape(shape3), axis=-1, keepdims=True)
        m_flat = jnp.broadcast_to(m, shape3).reshape(tm, tn)
        e = jnp.exp(h - m_flat)                             # lane-dense exp
        s = jnp.sum(e.reshape(shape3), axis=-1, keepdims=True)
        s_flat = jnp.broadcast_to(s, shape3).reshape(tm, tn)

        # Exact normalization (matches PyTorch's softmax; approx reciprocal
        # saved nothing here and cost ~1e-3 row-sum error).
        out_ref[...] = (e / s_flat).astype(out_ref.dtype)
        # For a partial last out_dim tile the padded columns form whole garbage
        # groups (tn % categories_dim == 0) that never reach HBM: the OOB part
        # of the block store is masked, and NaN/inf cannot cross group bounds.


def _vmem_capacity_bytes():
    try:
        return int(pltpu.get_tpu_info().vmem_capacity_bytes)
    except Exception:
        return 64 * 1024 * 1024          # conservative (v7x-sized) default


def _tile_params():
    if _vmem_capacity_bytes() >= 100 * 1024 * 1024:     # v5e / v6e (128 MiB)
        return dict(max_tm=512, max_tn=4096,
                    weight_slice_bytes=8 * 1024 * 1024,
                    vmem_limit_bytes=96 * 1024 * 1024)
    return dict(max_tm=256, max_tn=2048,                # v7x (64 MiB)
                weight_slice_bytes=3 * 1024 * 1024,
                vmem_limit_bytes=48 * 1024 * 1024)


def _pick_tiles(bsz, out_dim, in_dim, categories_dim, itemsize, p):
    # Batch tile: large, to amortize per-grid-step overhead and z re-reads.
    tm = bsz if bsz <= p["max_tm"] else (p["max_tm"] // 8) * 8
    # Out tile: multiple of 128 lanes AND of categories_dim so no softmax
    # group straddles a tile boundary (or full extent, always legal).
    align = 128 * categories_dim // math.gcd(128, categories_dim)
    if out_dim <= max(p["max_tn"], align):
        tn = out_dim
    else:
        tn = max((p["max_tn"] // align) * align, align)
    # K tile: bound the per-step (tn, tk) weight slice to the VMEM/DMA budget.
    if in_dim * tn * itemsize <= p["weight_slice_bytes"]:
        tk = in_dim                                      # no K tiling needed
    else:
        tk = max(128, (p["weight_slice_bytes"] // (tn * itemsize)) // 128 * 128)
    return tm, tn, tk


def categorical_layer(z, weight, bias, x_dim, categories_dim, *,
                      compute_dtype=jnp.bfloat16, out_dtype=jnp.float32):
    """Fused Linear + reshape + softmax(dim=2).

    z:      (B, in_dim)
    weight: (out_dim, in_dim)   PyTorch nn.Linear layout (no transpose needed)
    bias:   (out_dim,)
    compute_dtype: MXU operand dtype.  bf16 (default) halves the dominant
        weight HBM stream; jnp.float32 reproduces PyTorch numerics exactly.
        In production, cache the bf16 weight copy outside this call.
    out_dtype: output dtype (f32 default matches PyTorch; bf16 halves writeback).
    Returns (B, x_dim, categories_dim), softmax over the last axis.
    """
    bsz, in_dim = z.shape
    out_dim = x_dim * categories_dim
    assert weight.shape == (out_dim, in_dim)
    assert bias.shape == (out_dim,)

    p = _tile_params()
    itemsize = jnp.dtype(compute_dtype).itemsize
    tm, tn, tk = _pick_tiles(bsz, out_dim, in_dim, categories_dim, itemsize, p)
    assert tn % categories_dim == 0, "softmax groups must not straddle tiles"

    # One-time casts (bias stays f32; added in the f32 finalize).
    z_c = z if z.dtype == compute_dtype else z.astype(compute_dtype)
    w_c = weight if weight.dtype == compute_dtype else weight.astype(compute_dtype)
    b2 = bias.astype(jnp.float32).reshape(1, out_dim)

    # Zero-pad in_dim up to a multiple of tk (zeros contribute nothing to the
    # dot product); no-op when tk == in_dim or in_dim % tk == 0.
    nk = pl.cdiv(in_dim, tk)
    if in_dim % tk:
        pad = nk * tk - in_dim
        z_c = jnp.pad(z_c, ((0, 0), (0, pad)))
        w_c = jnp.pad(w_c, ((0, 0), (0, pad)))

    grid = (pl.cdiv(out_dim, tn), pl.cdiv(bsz, tm), nk)

    out_itemsize = jnp.dtype(out_dtype).itemsize
    cost = pl.CostEstimate(
        flops=2 * bsz * in_dim * out_dim + 6 * bsz * out_dim,
        transcendentals=bsz * out_dim,
        bytes_accessed=(z_c.size * itemsize + w_c.size * itemsize
                        + out_dim * 4 + bsz * out_dim * out_itemsize),
    )

    kernel = functools.partial(_categorical_kernel,
                               categories_dim=categories_dim)

    flat = pl.pallas_call(
        kernel,
        out_shape=jax.ShapeDtypeStruct((bsz, out_dim), out_dtype),
        grid=grid,
        in_specs=[
            # Grid order (out j, batch i, k): the weight tile's block index
            # does not depend on i, so it stays VMEM-resident across the whole
            # batch (full weight matrix is DMA'd from HBM exactly once), and
            # the out_dim axis being first lets v7x's two TensorCores split
            # the weight stream rather than each re-reading all of it.
            pl.BlockSpec((tm, tk), lambda j, i, k: (i, k)),    # z rows
            pl.BlockSpec((tn, tk), lambda j, i, k: (j, k)),    # weight rows
            pl.BlockSpec((1, tn), lambda j, i, k: (0, j)),     # bias slice
        ],
        out_specs=pl.BlockSpec((tm, tn), lambda j, i, k: (i, j)),  # lane-dense
        scratch_shapes=[pltpu.VMEM((tm, tn), jnp.float32)],        # f32 acc
        compiler_params=pltpu.CompilerParams(
            dimension_semantics=("parallel", "parallel", "arbitrary"),
            vmem_limit_bytes=p["vmem_limit_bytes"],
        ),
        cost_estimate=cost,
    )(z_c, w_c, b2)

    # Free row-major reshape in HBM; matches PyTorch .view/.resize semantics.
    return flat.reshape(bsz, x_dim, categories_dim)


if __name__ == "__main__":
    # Small shapes consistent with the module's forward.
    B = 2
    in_dim = 32
    x_dim = 8
    categories_dim = 16
    out_dim = x_dim * categories_dim

    key = jax.random.PRNGKey(0)
    k_z, k_w, k_b = jax.random.split(key, 3)

    z = jax.random.normal(k_z, (B, in_dim), dtype=jnp.float32)
    # Deterministic synthetic parameters (nn.Linear(in_dim, out_dim) shapes).
    weight = jax.random.normal(k_w, (out_dim, in_dim), dtype=jnp.float32) * 0.05
    bias = jax.random.normal(k_b, (out_dim,), dtype=jnp.float32) * 0.05

    # Pure-JAX f32 reference (PyTorch semantics).
    hidden_ref = z @ weight.T + bias
    ref = jax.nn.softmax(hidden_ref.reshape(B, x_dim, categories_dim), axis=2)

    # Default production path: bf16 operand streaming, f32 accumulate/softmax.
    pi_bf16 = jax.block_until_ready(
        categorical_layer(z, weight, bias, x_dim, categories_dim))
    assert pi_bf16.shape == (B, x_dim, categories_dim)
    assert bool(jnp.allclose(pi_bf16, ref, atol=5e-3, rtol=5e-3)), float(
        jnp.max(jnp.abs(pi_bf16 - ref)))
    # Exact division -> rows sum to 1 up to f32 rounding.
    assert bool(jnp.allclose(jnp.sum(pi_bf16, axis=2), 1.0, atol=1e-5))

    # Exact-numerics path: f32 operands (documented flag).
    pi_f32 = jax.block_until_ready(
        categorical_layer(z, weight, bias, x_dim, categories_dim,
                          compute_dtype=jnp.float32))
    assert bool(jnp.allclose(pi_f32, ref, atol=2e-3, rtol=2e-3)), float(
        jnp.max(jnp.abs(pi_f32 - ref)))
    assert bool(jnp.allclose(jnp.sum(pi_f32, axis=2), 1.0, atol=1e-5))

    print("KERNEL_OK")
</pallas_src>

<mosaic_0001>
module attributes {stable_mosaic.version = 11 : i64} {
  func.func @_categorical_kernel(%arg0: i32, %arg1: i32, %arg2: i32, %arg3: memref<2x32xbf16, #tpu.memory_space<vmem>>, %arg4: memref<128x32xbf16, #tpu.memory_space<vmem>>, %arg5: memref<1x128xf32, #tpu.memory_space<vmem>>, %arg6: memref<2x128xf32, #tpu.memory_space<vmem>>, %arg7: memref<2x128xf32, #tpu.memory_space<vmem>>) attributes {dimension_semantics = [#tpu.dimension_semantics<parallel>, #tpu.dimension_semantics<parallel>, #tpu.dimension_semantics<arbitrary>], iteration_bounds = array<i64: 1, 1, 1>, scalar_prefetch = 0 : i64, scratch_operands = 1 : i64, tpu.core_type = #tpu.core_type<tc>, window_params = [{transform_indices = @transform_0, window_bounds = array<i64: 2, 32>}, {transform_indices = @transform_1, window_bounds = array<i64: 128, 32>}, {transform_indices = @transform_2, window_bounds = array<i64: 1, 128>}, {transform_indices = @transform_3, window_bounds = array<i64: 2, 128>}]} {
    %c0_i32 = arith.constant 0 : i32
    %0 = arith.cmpi eq, %arg2, %c0_i32 : i32
    %1 = arith.extui %0 : i1 to i32
    %c0_i32_0 = arith.constant 0 : i32
    %2 = arith.cmpi ne, %1, %c0_i32_0 : i32
    scf.if %2 {
      %cst_10 = arith.constant 0.000000e+00 : f32
      %12 = vector.broadcast %cst_10 : f32 to vector<2x128xf32>
      %c0_11 = arith.constant 0 : index
      %c0_12 = arith.constant 0 : index
      %13 = vector.load %arg7[%c0_11, %c0_12] : memref<2x128xf32, #tpu.memory_space<vmem>>, vector<2x128xf32>
      tpu.vector_store %arg7[%c0_11, %c0_12], %12 {strides = array<i32>} : memref<2x128xf32, #tpu.memory_space<vmem>>, vector<2x128xf32>,
    } else {
    }
    %c0 = arith.constant 0 : index
    %c0_1 = arith.constant 0 : index
    %3 = vector.load %arg7[%c0, %c0_1] : memref<2x128xf32, #tpu.memory_space<vmem>>, vector<2x128xf32>
    %c0_2 = arith.constant 0 : index
    %c0_3 = arith.constant 0 : index
    %4 = vector.load %arg3[%c0_2, %c0_3] : memref<2x32xbf16, #tpu.memory_space<vmem>>, vector<2x32xbf16>
    %c0_4 = arith.constant 0 : index
    %c0_5 = arith.constant 0 : index
    %5 = vector.load %arg4[%c0_4, %c0_5] : memref<128x32xbf16, #tpu.memory_space<vmem>>, vector<128x32xbf16>
    %cst = arith.constant dense<0.000000e+00> : vector<2x128xf32>
    %6 = tpu.matmul %4, %5, %cst {dimension_numbers = #tpu.dot_dimension_numbers<[1], [1], [0], [0], [0, 0, 1, 0], [], []>} : vector<2x32xbf16>, vector<128x32xbf16>, vector<2x128xf32> -> vector<2x128xf32>
    %7 = arith.addf %3, %6 : vector<2x128xf32>
    %c0_6 = arith.constant 0 : index
    %c0_7 = arith.constant 0 : index
    %8 = vector.load %arg7[%c0_6, %c0_7] : memref<2x128xf32, #tpu.memory_space<vmem>>, vector<2x128xf32>
    tpu.vector_store %arg7[%c0_6, %c0_7], %7 {strides = array<i32>} : memref<2x128xf32, #tpu.memory_space<vmem>>, vector<2x128xf32>,
    %c0_i32_8 = arith.constant 0 : i32
    %9 = arith.cmpi eq, %arg2, %c0_i32_8 : i32
    %10 = arith.extui %9 : i1 to i32
    %c0_i32_9 = arith.constant 0 : i32
    %11 = arith.cmpi ne, %10, %c0_i32_9 : i32
    scf.if %11 {
      %c0_10 = arith.constant 0 : index
      %c0_11 = arith.constant 0 : index
      %12 = vector.load %arg7[%c0_10, %c0_11] : memref<2x128xf32, #tpu.memory_space<vmem>>, vector<2x128xf32>
      %c0_12 = arith.constant 0 : index
      %c0_13 = arith.constant 0 : index
      %13 = vector.load %arg5[%c0_12, %c0_13] : memref<1x128xf32, #tpu.memory_space<vmem>>, vector<1x128xf32>
      %14 = vector.broadcast %13 : vector<1x128xf32> to vector<2x128xf32>
      %15 = arith.addf %12, %14 : vector<2x128xf32>
      %16 = vector.shape_cast %15 : vector<2x128xf32> to vector<2x8x16xf32>
      %cst_14 = arith.constant dense<0xFF800000> : vector<2x8xf32>
      %17 = vector.multi_reduction <maximumf>, %16, %cst_14 [2] : vector<2x8x16xf32> to vector<2x8xf32>
      %18 = vector.shape_cast %17 : vector<2x8xf32> to vector<2x8x1xf32>
      %19 = vector.shape_cast %18 : vector<2x8x1xf32> to vector<2x8x1xf32>
      %20 = vector.broadcast %19 : vector<2x8x1xf32> to vector<2x8x16xf32>
      %21 = vector.shape_cast %20 : vector<2x8x16xf32> to vector<2x128xf32>
      %22 = arith.subf %15, %21 : vector<2x128xf32>
      %23 = math.exp %22 : vector<2x128xf32>
      %24 = vector.shape_cast %23 : vector<2x128xf32> to vector<2x8x16xf32>
      %cst_15 = arith.constant dense<0.000000e+00> : vector<2x8xf32>
      %25 = vector.multi_reduction <add>, %24, %cst_15 [2] : vector<2x8x16xf32> to vector<2x8xf32>
      %26 = vector.shape_cast %25 : vector<2x8xf32> to vector<2x8x1xf32>
      %27 = vector.shape_cast %26 : vector<2x8x1xf32> to vector<2x8x1xf32>
      %28 = vector.broadcast %27 : vector<2x8x1xf32> to vector<2x8x16xf32>
      %29 = vector.shape_cast %28 : vector<2x8x16xf32> to vector<2x128xf32>
      %30 = arith.divf %23, %29 : vector<2x128xf32>
      %c0_16 = arith.constant 0 : index
      %c0_17 = arith.constant 0 : index
      %31 = vector.load %arg6[%c0_16, %c0_17] : memref<2x128xf32, #tpu.memory_space<vmem>>, vector<2x128xf32>
      tpu.vector_store %arg6[%c0_16, %c0_17], %30 {strides = array<i32>} : memref<2x128xf32, #tpu.memory_space<vmem>>, vector<2x128xf32>,
    } else {
    }
    return
  }
  func.func @transform_0(%arg0: i32, %arg1: i32, %arg2: i32) -> (i32, i32) {
    %c0_i32 = arith.constant 0 : i32
    return %arg1, %arg2 : i32, i32
  }
  func.func @transform_1(%arg0: i32, %arg1: i32, %arg2: i32) -> (i32, i32) {
    %c0_i32 = arith.constant 0 : i32
    return %arg0, %arg2 : i32, i32
  }
  func.func @transform_2(%arg0: i32, %arg1: i32, %arg2: i32) -> (i32, i32) {
    %c0_i32 = arith.constant 0 : i32
    %c0_i32_0 = arith.constant 0 : i32
    return %c0_i32, %arg0 : i32, i32
  }
  func.func @transform_3(%arg0: i32, %arg1: i32, %arg2: i32) -> (i32, i32) {
    %c0_i32 = arith.constant 0 : i32
    return %arg1, %arg0 : i32, i32
  }
}

</mosaic_0001>

<bundles_post_ra>
// kernel: tpu_custom_call.1
= control target key start
LH: loop header
LB: loop body
LE: loop exit
PB: predicated region body
PF: predicated region fallthrough
CT: control target
= control target key end

     0   :  { %vm78_vm0 = vcmask 261120   ;;  %s774_s0 = inlined_call_operand.vmem [shape: bf16[2,32], index: 0, kind: input, shape index: {}]   ;;  %s775_s1 = inlined_call_operand.vmem [shape: bf16[128,32], index: 1, kind: input, shape index: {}]   ;;  %s776_s2 = inlined_call_operand.vmem [shape: f32[1,128], index: 2, kind: input, shape index: {}]   ;;  %s777_s3 = inlined_call_operand.hbm [shape: f32[2,128], index: 3, kind: output, shape index: {}]  }
   0x1   :  { %v522_v0 = vld [vmem:[%s775_s1 + $0x38] sm:$0xff] }
   0x2   :  { %v104_v1 = vsel %vm78_vm0, %v522_v0, 0 }
   0x3   :  { %8 = vsyncpa [#allocation4], 0  ;;  %106 = vmatpush.bf16.xpose.msra.mxu0 %v104_v1  ;;  %v521_v2 = vld [vmem:[%s775_s1 + $0x30] sm:$0xff]  ;;  %v520_v4 = vld [vmem:[%s775_s1 + $0x28] sm:$0xff]  ;;  %v565_v10 = vmov 0.0   ;;  %s567_s5 = smov 96  }
   0x4   :  { %v101_v3 = vsel %vm78_vm0, %v521_v2, 0  ;;  %v98_v5 = vsel %vm78_vm0, %v520_v4, 0  ;;  %v519_v6 = vld [vmem:[%s775_s1 + $0x20] sm:$0xff]  ;;  %v518_v8 = vld [vmem:[%s775_s1 + $0x18] sm:$0xff]  ;;  %19 = vst [vmem:[#allocation2] sm:$0x3] %v565_v10 }
   0x5   :  { %v95_v7 = vsel %vm78_vm0, %v519_v6, 0  ;;  %v92_v9 = vsel %vm78_vm0, %v518_v8, 0  ;;  %v517_v11 = vld [vmem:[%s775_s1 + $0x10] sm:$0xff]  ;;  %v516_v13 = vld [vmem:[%s775_s1 + $0x8] sm:$0xff]  ;;  %v515_v15 = vld [vmem:[%s775_s1] sm:$0xff]  ;;  %s566_s1 = smov 48  }
   0x6   :  { %v89_v12 = vsel %vm78_vm0, %v517_v11, 0  ;;  %v86_v14 = vsel %vm78_vm0, %v516_v13, 0  ;;  %v83_v16 = vsel %vm78_vm0, %v515_v15, 0  ;;  %v21_v17 = vld [vmem:[%s774_s0] sm:$0x1]  ;;  %s568_s0 = smov 80  }
   0x7   :  { %v534_v21 = vld [vmem:[%s776_s2] ss:$0 sm:$0xff]  ;;  %s569_s6 = smov 32   ;;  %s570_s2 = smov 16   ;;  %v573_v28 = vmov 1983009808  }
   0x8   :  { %s571_s7 = smov 112   ;;  %s572_s8 = smov 64   ;;  %v156_v29 = vunpack.c.l.s4 %v573_v28  ;;  %vm153_vm1 = vcmask 1047556   ;;  %v574_v38 = vmov 1934713408   ;;  %vm193_vm2 = vcmask 130048  }
   0x9   :  { %v180_v39 = vunpack.c.l.s4 %v574_v38  ;;  %vm282_vm3 = vcmask 392192   ;;  %vm284_vm4 = vcmask 523264   ;;  %vm286_vm5 = vcmask 654336   ;;  %s575_s9 = smov [#allocation3]   ;;  %s473_s13 = sshll.u32 %s777_s3, 4  ;;  %s474_s13 = int_to_ptr.hbm [resolvable:$true] %s473_s13 }
   0xa   :  { %v651_v33 = vunpack.c.0.s8 %v156_v29  ;;  %vm288_vm6 = vcmask 785408   ;;  %vm290_vm7 = vcmask 916480   ;;  %s471_s10 = sshll.u32 %s575_s9, 4  ;;  %s472_s10 = int_to_ptr.vmem [resolvable:$true] %s471_s10 }
   0xb   :  { %107 = vmatpush.bf16.xpose.msra.mxu0 %v101_v3  ;;  %v20_v18 = vld [vmem:[#allocation2] sm:$0x3]  ;;  %v659_v45 = vunpack.c.0.s8 %v180_v39 }
  0x13   :  { %108 = vmatpush.bf16.xpose.msra.mxu0 %v98_v5 }
  0x1b   :  { %109 = vmatpush.bf16.xpose.msra.mxu0 %v95_v7 }
  0x23   :  { %110 = vmatpush.bf16.xpose.msra.mxu0 %v92_v9 }
  0x2b   :  { %111 = vmatpush.bf16.xpose.msra.mxu0 %v89_v12 }
  0x33   :  { %112 = vmatpush.bf16.xpose.msra.mxu0 %v86_v14 }
  0x3b   :  { %113 = vmatpush.bf16.xpose.msra.mxu0 %v83_v16 }
  0x42   :  { %514 = vmatmul.msk.bf16.vlgmr.msra.gmra.mxu0 %vm78_vm0, %v21_v17 }
  0xbf   :  { %v115_v19 = vpop.f32.mrf.mxu0 }
  0xc0   :  { %v119_v20 = vadd.f32 %v115_v19, %v20_v18 }
  0xc2   :  { %120 = vst [vmem:[#allocation2] sm:$0x3] %v119_v20 }
  0xc7   :  { %v117_v22 = vpop.f32.mrf.mxu0 }
  0xc9   :  { %v124_v23 = vld [vmem:[#allocation2] sm:$0x3] }
  0xca   :  { %v635_v24 = vadd.f32 %v534_v21, %v124_v23 }
  0xcc   :  { %143 = vrot.lane.b32.xlu2 %v635_v24, %s566_s1  ;;  %134 = vrot.lane.b32.xlu1 %v635_v24, %s567_s5 }
  0xcd   :  { %137 = vrot.lane.b32.xlu0 %v635_v24, %s568_s0 }
  0xd4   :  { %146 = vrot.lane.b32.xlu2 %v635_v24, %s569_s6  ;;  %149 = vrot.lane.b32.xlu1 %v635_v24, %s570_s2 }
  0xd5   :  { %131 = vrot.lane.b32.xlu0 %v635_v24, %s571_s7 }
  0xdd   :  { %140 = vrot.lane.b32.xlu0 %v635_v24, %s572_s8 }
 0x126   :  { %v144_v27 = vpop.permute.xlu2 %143 }
 0x12e   :  { %v147_v42 = vpop.permute.xlu2 %146 }
 0x12f   :  { %v165_v48 = vrot.slane %v147_v42, 4 }
 0x13e   :  { %v135_v25 = vpop.permute.xlu1 %134 }
 0x13f   :  { %v138_v26 = vpop.permute.xlu0 %137  ;;  %v152_v30 = vrot.slane %v135_v25, 4 }
 0x140   :  { %v159_v31 = vrot.slane %v138_v26, 4 }
 0x141   :  { %v154_v36 = vsel %vm153_vm1, %v152_v30, %v635_v24 }
 0x142   :  { %v158_v43 = vperm.slane %v154_v36, %v651_v33 }
 0x146   :  { %v150_v32 = vpop.permute.xlu1 %149 }
 0x147   :  { %v171_v34 = vrot.slane %v150_v32, 4  ;;  %v132_v35 = vpop.permute.xlu0 %131 }
 0x148   :  { %v160_v37 = vsel %vm153_vm1, %v159_v31, %v132_v35 }
 0x149   :  { %v164_v40 = vperm.slane %v160_v37, %v651_v33  ;;  %v172_v41 = vsel %vm153_vm1, %v171_v34, %v144_v27 }
 0x14a   :  { %v176_v46 = vperm.slane %v172_v41, %v651_v33 }
 0x14b   :  { %v177_v44 = vrot.slane %v164_v40, 4 }
 0x14c   :  { %v183_v52 = vrot.slane %v176_v46, 4 }
 0x14d   :  { %v178_v47 = vsel %vm153_vm1, %v177_v44, %v158_v43 }
 0x14e   :  { %v182_v51 = vperm.slane %v178_v47, %v659_v45 }
 0x14f   :  { %v141_v49 = vpop.permute.xlu0 %140 }
 0x150   :  { %v166_v50 = vsel %vm153_vm1, %v165_v48, %v141_v49  ;;  %v191_v56 = vrot.slane %v182_v51, 4 }
 0x151   :  { %v170_v53 = vperm.slane %v166_v50, %v651_v33 }
 0x153   :  { %v184_v54 = vsel %vm153_vm1, %v183_v52, %v170_v53 }
 0x154   :  { %v188_v55 = vperm.slane %v184_v54, %v659_v45 }
 0x156   :  { %v192_v57 = vsel %vm153_vm1, %v188_v55, %v191_v56  ;;  %v189_v58 = vrot.slane %v188_v55, 4 }
 0x157   :  { %v197_v59 = vsel %vm193_vm2, %v192_v57, -inf }
 0x158   :  { %198 = vmax.xlane.f32.xlu1 %v197_v59  ;;  %v190_v60 = vsel %vm153_vm1, %v189_v58, %v182_v51 }
 0x159   :  { %v194_v61 = vsel %vm193_vm2, %v190_v60, -inf }
 0x15a   :  { %195 = vmax.xlane.f32.xlu2 %v194_v61 }
 0x1cb   :  { %v199_v62 = vpop.xlane.xlu1 %198 }
 0x1cc   :  { %v210_v63 = vrot.slane %v199_v62, 4  ;;  %v215_v0 = vperm.slane %v199_v62, %v651_v33 }
 0x1cd   :  { %v196_v1 = vpop.xlane.xlu2 %195 }
 0x1ce   :  { %v220_v2 = vrot.slane %v215_v0, 4  ;;  %v200_v3 = vrot.slane %v196_v1, 4  ;;  %v205_v4 = vperm.slane %v196_v1, %v651_v33  ;;  %v211_v5 = vsel %vm153_vm1, 0.0, %v210_v63 }
 0x1cf   :  { %v219_v11 = vperm.slane %v211_v5, %v651_v33 }
 0x1d0   :  { %v201_v6 = vsel %vm153_vm1, 0.0, %v200_v3  ;;  %v222_v7 = vrot.slane %v205_v4, 4  ;;  %v221_v9 = vsel %vm153_vm1, %v220_v2, %v205_v4 }
 0x1d1   :  { %v209_v8 = vperm.slane %v201_v6, %v651_v33  ;;  %v227_v14 = vperm.slane %v221_v9, %v659_v45  ;;  %v232_v22 = vrot.slane %v219_v11, 4 }
 0x1d2   :  { %v223_v10 = vsel %vm153_vm1, %v215_v0, %v222_v7 }
 0x1d3   :  { %v234_v12 = vrot.slane %v209_v8, 4  ;;  %v231_v13 = vperm.slane %v223_v10, %v659_v45  ;;  %v244_v18 = vrot.slane %v227_v14, 4  ;;  %v233_v25 = vsel %vm153_vm1, %v232_v22, %v209_v8 }
 0x1d4   :  { %v239_v26 = vperm.slane %v233_v25, %v659_v45 }
 0x1d5   :  { %257 = vrot.lane.b32.xlu0 %v231_v13, %s569_s6  ;;  %v235_v15 = vsel %vm153_vm1, %v219_v11, %v234_v12  ;;  %v245_v20 = vsel %vm153_vm1, 0.0, %v244_v18  ;;  %v246_v21 = vrot.slane %v231_v13, 4 }
 0x1d6   :  { %v243_v16 = vperm.slane %v235_v15, %v659_v45  ;;  %v248_v27 = vrot.slane %v239_v26, 4 }
 0x1d7   :  { %v247_v23 = vsel %vm153_vm1, 0.0, %v246_v21 }
 0x1d8   :  { %273 = vrot.lane.b32.xlu2 %v243_v16, %s567_s5  ;;  %v250_v17 = vrot.slane %v243_v16, 4  ;;  %v249_v28 = vsel %vm153_vm1, 0.0, %v248_v27 }
 0x1da   :  { %v251_v19 = vsel %vm153_vm1, 0.0, %v250_v17 }
 0x1db   :  { %277 = vrot.lane.b32.xlu1 %v251_v19, %s571_s7 }
 0x1dd   :  { %253 = vrot.lane.b32.xlu0 %v245_v20, %s570_s2 }
 0x1e5   :  { %261 = vrot.lane.b32.xlu0 %v247_v23, %s566_s1 }
 0x1ed   :  { %265 = vrot.lane.b32.xlu0 %v239_v26, %s572_s8 }
 0x1f5   :  { %269 = vrot.lane.b32.xlu0 %v249_v28, %s568_s0 }
 0x232   :  { %v274_v39 = vpop.permute.xlu2 %273 }
 0x247   :  { %v258_v29 = vpop.permute.xlu0 %257 }
 0x24d   :  { %v278_v41 = vpop.permute.xlu1 %277 }
 0x24f   :  { %v254_v30 = vpop.permute.xlu0 %253 }
 0x250   :  { %v280_v34 = vsel %vm193_vm2, %v227_v14, %v254_v30 }
 0x251   :  { %v281_v35 = vsel %vm78_vm0, %v280_v34, %v258_v29 }
 0x257   :  { %v262_v31 = vpop.permute.xlu0 %261 }
 0x258   :  { %v283_v36 = vsel %vm282_vm3, %v281_v35, %v262_v31 }
 0x25f   :  { %v266_v32 = vpop.permute.xlu0 %265 }
 0x260   :  { %v285_v37 = vsel %vm284_vm4, %v283_v36, %v266_v32 }
 0x267   :  { %v270_v38 = vpop.permute.xlu0 %269 }
 0x268   :  { %v287_v40 = vsel %vm286_vm5, %v285_v37, %v270_v38 }
 0x269   :  { %v289_v42 = vsel %vm288_vm6, %v287_v40, %v274_v39 }
 0x26a   :  { %v291_v43 = vsel %vm290_vm7, %v289_v42, %v278_v41 }
 0x26b   :  { %v292_v44 = vsub.f32 %v635_v24, %v291_v43 }
 0x26d   :  { %v293_v46 = vmul.f32 1.442695, %v292_v44 }
 0x26f   :  { %535 = vpow2.f32 %v293_v46 }
 0x275   :  { %v705_v47 = vpop.eup %535 }
 0x276   :  { %308 = vrot.lane.b32.xlu1 %v705_v47, %s566_s1  ;;  %314 = vrot.lane.b32.xlu2 %v705_v47, %s570_s2 }
 0x277   :  { %302 = vrot.lane.b32.xlu0 %v705_v47, %s568_s0 }
 0x27e   :  { %305 = vrot.lane.b32.xlu2 %v705_v47, %s572_s8 }
 0x27f   :  { %296 = vrot.lane.b32.xlu0 %v705_v47, %s571_s7 }
 0x287   :  { %299 = vrot.lane.b32.xlu0 %v705_v47, %s567_s5 }
 0x28f   :  { %311 = vrot.lane.b32.xlu0 %v705_v47, %s569_s6 }
 0x2d0   :  { %v315_v51 = vpop.permute.xlu2 %314 }
 0x2d1   :  { %v335_v56 = vrot.slane %v315_v51, 4 }
 0x2d8   :  { %v306_v1 = vpop.permute.xlu2 %305 }
 0x2e8   :  { %v309_v54 = vpop.permute.xlu1 %308 }
 0x2e9   :  { %v303_v24 = vpop.permute.xlu0 %302  ;;  %v336_v59 = vsel %vm153_vm1, %v335_v56, %v309_v54 }
 0x2ea   :  { %v323_v49 = vrot.slane %v303_v24, 4  ;;  %v340_v61 = vperm.slane %v336_v59, %v651_v33 }
 0x2ec   :  { %v347_v4 = vrot.slane %v340_v61, 4 }
 0x2f1   :  { %v297_v48 = vpop.permute.xlu0 %296 }
 0x2f2   :  { %v324_v50 = vsel %vm153_vm1, %v323_v49, %v297_v48 }
 0x2f3   :  { %v328_v55 = vperm.slane %v324_v50, %v651_v33 }
 0x2f5   :  { %v341_v60 = vrot.slane %v328_v55, 4 }
 0x2f9   :  { %v300_v52 = vpop.permute.xlu0 %299 }
 0x2fa   :  { %v317_v53 = vrot.slane %v300_v52, 4 }
 0x2fc   :  { %v318_v57 = vsel %vm153_vm1, %v317_v53, %v705_v47 }
 0x2fd   :  { %v322_v58 = vperm.slane %v318_v57, %v651_v33 }
 0x2ff   :  { %v342_v63 = vsel %vm153_vm1, %v341_v60, %v322_v58 }
 0x300   :  { %v346_v3 = vperm.slane %v342_v63, %v659_v45 }
 0x301   :  { %v312_v62 = vpop.permute.xlu0 %311 }
 0x302   :  { %v329_v0 = vrot.slane %v312_v62, 4  ;;  %v355_v8 = vrot.slane %v346_v3, 4 }
 0x304   :  { %v330_v2 = vsel %vm153_vm1, %v329_v0, %v306_v1 }
 0x305   :  { %v334_v5 = vperm.slane %v330_v2, %v651_v33 }
 0x307   :  { %v348_v6 = vsel %vm153_vm1, %v347_v4, %v334_v5 }
 0x308   :  { %v352_v7 = vperm.slane %v348_v6, %v659_v45 }
 0x30a   :  { %v356_v9 = vsel %vm153_vm1, %v352_v7, %v355_v8  ;;  %v353_v10 = vrot.slane %v352_v7, 4 }
 0x30b   :  { %v360_v11 = vsel %vm193_vm2, %v356_v9, 0.0 }
 0x30c   :  { %361 = vadd.xlane.f32.xlu1 %v360_v11  ;;  %v354_v12 = vsel %vm153_vm1, %v353_v10, %v346_v3 }
 0x30d   :  { %v357_v13 = vsel %vm193_vm2, %v354_v12, 0.0 }
 0x30e   :  { %358 = vadd.xlane.f32.xlu0 %v357_v13 }
 0x37f   :  { %v362_v14 = vpop.xlane.xlu1 %361 }
 0x380   :  { %v373_v15 = vrot.slane %v362_v14, 4  ;;  %v378_v16 = vperm.slane %v362_v14, %v651_v33 }
 0x381   :  { %v359_v17 = vpop.xlane.xlu0 %358 }
 0x382   :  { %v383_v18 = vrot.slane %v378_v16, 4  ;;  %v363_v19 = vrot.slane %v359_v17, 4  ;;  %v368_v20 = vperm.slane %v359_v17, %v651_v33  ;;  %v374_v21 = vsel %vm153_vm1, 0.0, %v373_v15 }
 0x383   :  { %v382_v28 = vperm.slane %v374_v21, %v651_v33 }
 0x384   :  { %v364_v22 = vsel %vm153_vm1, 0.0, %v363_v19  ;;  %v385_v23 = vrot.slane %v368_v20, 4  ;;  %v384_v26 = vsel %vm153_vm1, %v383_v18, %v368_v20 }
 0x385   :  { %v372_v25 = vperm.slane %v364_v22, %v651_v33  ;;  %v390_v31 = vperm.slane %v384_v26, %v659_v45  ;;  %v395_v33 = vrot.slane %v382_v28, 4 }
 0x386   :  { %v386_v27 = vsel %vm153_vm1, %v378_v16, %v385_v23 }
 0x387   :  { %v397_v29 = vrot.slane %v372_v25, 4  ;;  %v394_v30 = vperm.slane %v386_v27, %v659_v45  ;;  %v407_v35 = vrot.slane %v390_v31, 4  ;;  %v396_v39 = vsel %vm153_vm1, %v395_v33, %v372_v25 }
 0x388   :  { %v402_v40 = vperm.slane %v396_v39, %v659_v45 }
 0x389   :  { %420 = vrot.lane.b32.xlu2 %v394_v30, %s569_s6  ;;  %v398_v32 = vsel %vm153_vm1, %v382_v28, %v397_v29  ;;  %v408_v36 = vsel %vm153_vm1, 0.0, %v407_v35  ;;  %v409_v37 = vrot.slane %v394_v30, 4 }
 0x38a   :  { %v406_v34 = vperm.slane %v398_v32, %v659_v45  ;;  %v411_v41 = vrot.slane %v402_v40, 4 }
 0x38b   :  { %v410_v38 = vsel %vm153_vm1, 0.0, %v409_v37 }
 0x38c   :  { %436 = vrot.lane.b32.xlu1 %v406_v34, %s567_s5  ;;  %v412_v42 = vsel %vm153_vm1, 0.0, %v411_v41  ;;  %v413_v43 = vrot.slane %v406_v34, 4 }
 0x38e   :  { %v414_v44 = vsel %vm153_vm1, 0.0, %v413_v43 }
 0x391   :  { %416 = vrot.lane.b32.xlu2 %v408_v36, %s570_s2 }
 0x399   :  { %424 = vrot.lane.b32.xlu2 %v410_v38, %s566_s1 }
 0x3a1   :  { %428 = vrot.lane.b32.xlu2 %v402_v40, %s572_s8 }
 0x3a9   :  { %432 = vrot.lane.b32.xlu2 %v412_v42, %s568_s0 }
 0x3b1   :  { %440 = vrot.lane.b32.xlu2 %v414_v44, %s571_s7 }
 0x3e3   :  { %v421_v46 = vpop.permute.xlu2 %420 }
 0x3eb   :  { %v417_v24 = vpop.permute.xlu2 %416 }
 0x3ec   :  { %v443_v50 = vsel %vm193_vm2, %v390_v31, %v417_v24 }
 0x3ed   :  { %v444_v45 = vsel %vm78_vm0, %v443_v50, %v421_v46 }
 0x3f3   :  { %v425_v48 = vpop.permute.xlu2 %424 }
 0x3f4   :  { %v445_v52 = vsel %vm282_vm3, %v444_v45, %v425_v48 }
 0x3fb   :  { %v429_v49 = vpop.permute.xlu2 %428 }
 0x3fc   :  { %v446_v53 = vsel %vm284_vm4, %v445_v52, %v429_v49 }
 0x3fe   :  { %v437_v55 = vpop.permute.xlu1 %436 }
 0x403   :  { %v433_v51 = vpop.permute.xlu2 %432 }
 0x404   :  { %v447_v54 = vsel %vm286_vm5, %v446_v53, %v433_v51 }
 0x405   :  { %v448_v56 = vsel %vm288_vm6, %v447_v54, %v437_v55 }
 0x40b   :  { %v441_v57 = vpop.permute.xlu2 %440 }
 0x40c   :  { %v449_v58 = vsel %vm290_vm7, %v448_v56, %v441_v57 }
 0x40d   :  { %537 = vrcp.f32 %v449_v58  ;;  %v461_v62 = vand.u32 2147483648, %v449_v58  ;;  %v459_v0 = vand.u32 2147483647, %v449_v58  ;;  %vm455_vm9 = vweird.f32 %v449_v58 }
 0x40f   :  { %v462_v2 = vor.u32 1.1754944e-38, %v461_v62  ;;  %vm460_vm11 = vcmp.eq.f32.partialorder %v459_v0, 8.507059e+37 }
 0x413   :  { %v538_v59 = vpop.eup %537 }
 0x414   :  { %v451_v60 = vmul.f32 %v538_v59, %v449_v58  ;;  %vm456_vm8 = vweird.f32 %v538_v59 }
 0x415   :  { %vm457_vm10 = vmor %vm455_vm9, %vm456_vm8 }
 0x416   :  { %v452_v61 = vsub.f32 1.0, %v451_v60 }
 0x418   :  { %v453_v63 = vmul.f32 %v538_v59, %v452_v61 }
 0x41a   :  { %v454_v1 = vadd.f32 %v538_v59, %v453_v63 }
 0x41c   :  { %v458_v3 = vsel %vm457_vm10, %v538_v59, %v454_v1 }
 0x41d   :  { %v463_v4 = vsel %vm460_vm11, %v462_v2, %v458_v3 }
 0x41e   :  { %v464_v5 = vmul.f32 %v705_v47, %v463_v4 }
 0x420   :  { %465 = vst [vmem:[#allocation3] sm:$0x3] %v464_v5 }
 0x421   :  { %476 = dma.vmem_to_hbm [thread:$0]  %s472_s10, 32, %s474_s13, [#allocation4]  }
 0x422   :  { %563 = dma.done.wait [#allocation4], 32  }
 0x423   :  { %564 = vsyncadd [#allocation4], 4294967264 }
 0x424   :  { %481 = vsyncpa [#allocation4], 1 }

</bundles_post_ra>
